<compile_context>
chip_gen: v5e
topology: v5e:2x2
jax: 0.10.0
libtpu: 0.0.40
codegen_flags: <defaults>
</compile_context>

<pallas_src>
import functools

import jax
import jax.numpy as jnp
from jax import lax
from jax.experimental import pallas as pl
from jax.experimental.pallas import tpu as pltpu

_LANE = 128
_SUBLANE = 8
_MIB = 1024 * 1024


def _round_up(x, m):
    return (x + m - 1) // m * m


def _physical_vmem_bytes():
    """Per-core VMEM capacity; conservative (v7x) fallback if unknown."""
    try:
        info = pltpu.get_tpu_info()
        v = getattr(info, "vmem_capacity_bytes", None)
        if v:
            return int(v)
    except Exception:
        pass
    return 64 * _MIB


# -----------------------------------------------------------------------------
# Kernels
# -----------------------------------------------------------------------------
def _lif_core(x, w, mem, thr, *, membrane_decay, membrane_reset,
              threshold_decay, threshold_target):
    """LIF with threshold decay + adaptive threshold for one [B, TN] tile."""
    # bf16 MXU feed (spikes exact in bf16; weights already stored bf16).
    z = jnp.dot(x.astype(jnp.bfloat16), w.astype(jnp.bfloat16),
                preferred_element_type=jnp.float32)                # [B, TN]
    mem = mem * membrane_decay + z                                 # leaky integrate
    spiked = mem >= thr                                            # single compare
    spikes = spiked.astype(jnp.float32)
    mem_new = jnp.where(spiked, jnp.float32(membrane_reset), mem)  # reset on spike
    thr_new = jnp.where(spiked, jnp.float32(threshold_target),
                        thr * threshold_decay)                     # adaptive threshold
    return spikes, mem_new, thr_new


def _lif_eval_kernel(x_ref, w_ref, mem_ref, thr_ref,
                     spk_out, mem_out, thr_out, *,
                     membrane_decay, membrane_reset, threshold_decay,
                     threshold_target):
    spikes, mem_new, thr_new = _lif_core(
        x_ref[...], w_ref[...], mem_ref[...], thr_ref[...],
        membrane_decay=membrane_decay, membrane_reset=membrane_reset,
        threshold_decay=threshold_decay, threshold_target=threshold_target)
    spk_out[...] = spikes.astype(spk_out.dtype)
    mem_out[...] = mem_new
    thr_out[...] = thr_new


def _lif_train_gated_kernel(x_ref, w_ref, mem_ref, thr_ref, tr_post_ref,
                            spk_out, mem_out, thr_out, tr_post_out, *,
                            membrane_decay, membrane_reset, threshold_decay,
                            threshold_target, trace_decay):
    """Train step with the STDP weight path compiled out (a_pos == a_neg)."""
    spikes, mem_new, thr_new = _lif_core(
        x_ref[...], w_ref[...], mem_ref[...], thr_ref[...],
        membrane_decay=membrane_decay, membrane_reset=membrane_reset,
        threshold_decay=threshold_decay, threshold_target=threshold_target)
    spk_out[...] = spikes.astype(spk_out.dtype)
    mem_out[...] = mem_new
    thr_out[...] = thr_new
    tr_post_out[...] = jnp.clip(tr_post_ref[...] * trace_decay + spikes, 0.0, 1.0)


def _lif_train_stdp_kernel(x_ref, w_ref, mem_ref, thr_ref, tr_pre_ref,
                           tr_post_ref,
                           spk_out, mem_out, thr_out, tr_post_out, w_out, *,
                           membrane_decay, membrane_reset, threshold_decay,
                           threshold_target, trace_decay, a_pos, a_neg):
    """Train step with non-degenerate STDP (a_pos != a_neg)."""
    spikes, mem_new, thr_new = _lif_core(
        x_ref[...], w_ref[...], mem_ref[...], thr_ref[...],
        membrane_decay=membrane_decay, membrane_reset=membrane_reset,
        threshold_decay=threshold_decay, threshold_target=threshold_target)
    spk_out[...] = spikes.astype(spk_out.dtype)
    mem_out[...] = mem_new
    thr_out[...] = thr_new

    # Post-synaptic STDP trace for this Out tile.
    tr_post = jnp.clip(tr_post_ref[...] * trace_decay + spikes, 0.0, 1.0)
    tr_post_out[...] = tr_post

    # Reference rule: potentiation - depression
    #   == (a_pos - a_neg) * outer(trace_pre, trace_post), summed over batch
    # (both terms use the SAME trace product in the reference, so the collapse
    # to a single matmul is exact).  Contract over the batch dim directly.
    # tr_pre_ref is already a bf16 copy produced once by the trace kernel.
    # TODO(synk): per review, verify with pl.lower_as_mlir that Mosaic feeds
    #             the transposed lhs to the MXU rather than materializing a
    #             full [In,B] VMEM transpose per Out tile.
    dw = lax.dot_general(
        tr_pre_ref[...], tr_post.astype(jnp.bfloat16),
        dimension_numbers=(((0,), (0,)), ((), ())),
        preferred_element_type=jnp.float32)                        # [In, TN]
    w_new = w_ref[...].astype(jnp.float32) + (a_pos - a_neg) * dw
    w_out[...] = jnp.clip(w_new, -0.1, 0.1).astype(w_out.dtype)


def _trace_pre_kernel(tr_ref, x_ref, tr_out, *, trace_decay):
    """trace_pre <- clip(trace_pre * decay + in_spikes, 0, 1), one [B, TI] tile."""
    tr_out[...] = jnp.clip(
        tr_ref[...] * trace_decay + x_ref[...].astype(jnp.float32), 0.0, 1.0)


def _trace_pre_dual_kernel(tr_ref, x_ref, tr_out, tr_bf_out, *, trace_decay):
    """Same as above, additionally emits a bf16 copy for the main kernel's MXU."""
    tr_new = jnp.clip(
        tr_ref[...] * trace_decay + x_ref[...].astype(jnp.float32), 0.0, 1.0)
    tr_out[...] = tr_new
    tr_bf_out[...] = tr_new.astype(jnp.bfloat16)


# -----------------------------------------------------------------------------
# Module wrapper
# -----------------------------------------------------------------------------
class STDPLinear:
    """JAX/Pallas port of the PyTorch STDPLinear module (forward pass)."""

    def __init__(self, in_features, out_features, batch_size=128,
                 threshold_reset=1.0, threshold_decay=0.95,
                 membrane_reset=0.1, membrane_decay=0.99,
                 a_pos=0.005, a_neg=0.005, trace_decay=0.95,
                 plasticity_reward=1.0, plasticity_punish=1.0,
                 tile_n=None, tile_in=None, key=None):
        if key is None:
            key = jax.random.PRNGKey(0)
        self.in_features = in_features
        self.out_features = out_features
        self.batch_size = batch_size
        self.membrane_reset = float(membrane_reset)
        self.membrane_decay = float(membrane_decay)
        self.threshold_reset = float(threshold_reset)
        self.threshold_decay = float(threshold_decay)
        self.a_pos = float(a_pos)
        self.a_neg = float(a_neg)
        self.trace_decay = float(trace_decay)
        # Accepted for API parity; only used by the reference's apply_reward().
        self.plasticity_reward = float(plasticity_reward)
        self.plasticity_punish = float(plasticity_punish)
        # Kept for API parity; the kernel bakes `threshold_reset` as a scalar
        # instead of streaming this constant [B, Out] tensor from HBM.
        self.threshold_targets = jnp.full((batch_size, out_features),
                                          self.threshold_reset, jnp.float32)

        # With the default a_pos == a_neg the STDP update is identically zero,
        # so the whole dw / weight-writeback path is compiled out.
        self._stdp_active = self.a_pos != self.a_neg
        self._w_clamped = self._stdp_active  # gated path clamps lazily once

        # Generation-aware VMEM sizing (64 MiB v7x vs 128 MiB v5e/v6e).
        phys_vmem = _physical_vmem_bytes()
        self._vmem_limit = int(min(max(phys_vmem - 24 * _MIB, 32 * _MIB),
                                   100 * _MIB))
        self._vmem_budget = self._vmem_limit - 8 * _MIB

        # Physical (padded) sizes: lanes multiple of 128, batch multiple of 8,
        # so every output store is lane-dense (no masked vst.msk stores).
        self._B = _round_up(batch_size, _SUBLANE)
        self._In = _round_up(in_features, _LANE)
        self._Out = _round_up(out_features, _LANE)
        self._tn = int(tile_n) if tile_n else self._pick_tile_n()
        self._ti = int(tile_in) if tile_in else self._pick_tile_in()
        assert self._Out % self._tn == 0 and self._In % self._ti == 0

        self._cparams = pltpu.CompilerParams(
            dimension_semantics=("parallel",),
            vmem_limit_bytes=self._vmem_limit)

        # --- parameter / state init (mirrors torch __init__), zero-padded -----
        w = jax.random.uniform(key, (in_features, out_features),
                               jnp.float32) * (1.0 / (in_features * 1))
        # Weights stored bf16: halves the dominant HBM stream (read each step,
        # read+write when STDP is active).
        self._weights = self._pad2(w.astype(jnp.bfloat16), self._In, self._Out)
        # Pad membrane with -inf / thresholds with +inf: padded neurons can
        # never spike, so the pad region of every state tensor stays fixed and
        # never contaminates the batch-summed STDP update.
        self._membrane = self._pad2(
            jnp.full((batch_size, out_features), self.membrane_reset, jnp.float32),
            self._B, self._Out, value=float("-inf"))
        self._thresholds = self._pad2(
            jnp.full((batch_size, out_features), self.threshold_reset, jnp.float32),
            self._B, self._Out, value=float("inf"))
        # Torch keeps traces 1-D ones(in)/ones(out); after the first update they
        # broadcast against the batched spikes, so storing them pre-broadcast
        # gives identical numerics.  Pad region is zero -> contributes 0 to dw.
        self._trace_pre = self._pad2(
            jnp.ones((batch_size, in_features), jnp.float32), self._B, self._In)
        self._trace_post = self._pad2(
            jnp.ones((batch_size, out_features), jnp.float32), self._B, self._Out)
        self._out_spikes = jnp.zeros((self._B, self._Out), jnp.bfloat16)

        # jit + donation so the pallas-level aliases become true in-place updates.
        train_fn, train_donate = self._make_train_step()
        self._train_step = jax.jit(train_fn, donate_argnums=train_donate)
        self._eval_step = jax.jit(self._make_eval_step(), donate_argnums=(2, 3))

    # -- helpers ---------------------------------------------------------------
    @staticmethod
    def _pad2(a, rows, cols, value=0.0):
        r, c = a.shape
        if (r, c) == (rows, cols):
            return a
        return jnp.pad(a, ((0, rows - r), (0, cols - c)), constant_values=value)

    def _step_vmem_bytes(self, tn):
        """Rough per-step VMEM footprint for the (worst-case) train call."""
        B, In = self._B, self._In
        wt = In * tn * 2                       # one bf16 weight tile
        st = B * tn * 4                        # one f32 [B, tn] state tile
        b = 2 * wt                             # weights in (double-buffered)
        b += 2 * 3 * st                        # mem / thr / trace_post in
        b += 2 * (3 * st + B * tn * 2)         # mem / thr / trace_post / spk out
        b += 2 * B * In * 2                    # resident x (bf16, double-buffered)
        b += st                                # z temp
        if self._stdp_active:
            b += 2 * wt                        # weights out
            b += 2 * B * In * 2                # resident bf16 trace_pre copy
            b += 2 * In * tn * 4               # dw + f32 weight upcast temps
        return b

    def _pick_tile_n(self):
        fitting = [tn for tn in (1024, 512, 256, 128)
                   if self._Out % tn == 0
                   and self._step_vmem_bytes(tn) <= self._vmem_budget]
        if not fitting:
            return 128
        # Prefer a grid deep enough (>=8 steps total, ~4 per TC on v7x) so the
        # parallel Out axis keeps both TensorCores fed and the DMA pipeline deep.
        deep = [tn for tn in fitting if self._Out // tn >= 8]
        return deep[0] if deep else fitting[0]

    def _pick_tile_in(self):
        for ti in (512, 256, 128):
            if self._In % ti == 0:
                return ti
        return 128

    # -- pallas_call builders ----------------------------------------------------
    def _make_eval_step(self):
        B, In, Out, tn = self._B, self._In, self._Out, self._tn
        kernel = functools.partial(
            _lif_eval_kernel,
            membrane_decay=self.membrane_decay,
            membrane_reset=self.membrane_reset,
            threshold_decay=self.threshold_decay,
            threshold_target=self.threshold_reset)
        call = pl.pallas_call(
            kernel,
            out_shape=(jax.ShapeDtypeStruct((B, Out), jnp.bfloat16),  # spikes
                       jax.ShapeDtypeStruct((B, Out), jnp.float32),   # membrane
                       jax.ShapeDtypeStruct((B, Out), jnp.float32)),  # thresholds
            grid=(Out // tn,),
            in_specs=[pl.BlockSpec((B, In), lambda j: (0, 0)),    # x (resident)
                      pl.BlockSpec((In, tn), lambda j: (0, j)),   # weights tile (bf16)
                      pl.BlockSpec((B, tn), lambda j: (0, j)),    # membrane tile
                      pl.BlockSpec((B, tn), lambda j: (0, j))],   # thresholds tile
            out_specs=(pl.BlockSpec((B, tn), lambda j: (0, j)),
                       pl.BlockSpec((B, tn), lambda j: (0, j)),
                       pl.BlockSpec((B, tn), lambda j: (0, j))),
            # In-place membrane / thresholds; weights & traces are NOT written
            # back at all in eval mode.
            input_output_aliases={2: 1, 3: 2},
            compiler_params=self._cparams,
        )
        return lambda x, w, mem, thr: call(x, w, mem, thr)

    def _make_train_step(self):
        B, In, Out, tn, ti = self._B, self._In, self._Out, self._tn, self._ti

        lif_kw = dict(membrane_decay=self.membrane_decay,
                      membrane_reset=self.membrane_reset,
                      threshold_decay=self.threshold_decay,
                      threshold_target=self.threshold_reset,
                      trace_decay=self.trace_decay)

        if self._stdp_active:
            # trace_pre update + bf16 copy for the main kernel's MXU feed.
            trace_call = pl.pallas_call(
                functools.partial(_trace_pre_dual_kernel,
                                  trace_decay=self.trace_decay),
                out_shape=(jax.ShapeDtypeStruct((B, In), jnp.float32),
                           jax.ShapeDtypeStruct((B, In), jnp.bfloat16)),
                grid=(In // ti,),
                in_specs=[pl.BlockSpec((B, ti), lambda j: (0, j)),
                          pl.BlockSpec((B, ti), lambda j: (0, j))],
                out_specs=(pl.BlockSpec((B, ti), lambda j: (0, j)),
                           pl.BlockSpec((B, ti), lambda j: (0, j))),
                input_output_aliases={0: 0},
                compiler_params=self._cparams,
            )

            main_call = pl.pallas_call(
                functools.partial(_lif_train_stdp_kernel, **lif_kw,
                                  a_pos=self.a_pos, a_neg=self.a_neg),
                out_shape=(jax.ShapeDtypeStruct((B, Out), jnp.bfloat16),   # spikes
                           jax.ShapeDtypeStruct((B, Out), jnp.float32),    # membrane
                           jax.ShapeDtypeStruct((B, Out), jnp.float32),    # thresholds
                           jax.ShapeDtypeStruct((B, Out), jnp.float32),    # trace_post
                           jax.ShapeDtypeStruct((In, Out), jnp.bfloat16)), # weights
                grid=(Out // tn,),
                in_specs=[pl.BlockSpec((B, In), lambda j: (0, 0)),    # x (resident)
                          pl.BlockSpec((In, tn), lambda j: (0, j)),   # weights tile
                          pl.BlockSpec((B, tn), lambda j: (0, j)),    # membrane tile
                          pl.BlockSpec((B, tn), lambda j: (0, j)),    # thresholds tile
                          pl.BlockSpec((B, In), lambda j: (0, 0)),    # trace_pre bf16 (resident)
                          pl.BlockSpec((B, tn), lambda j: (0, j))],   # trace_post tile
                out_specs=(pl.BlockSpec((B, tn), lambda j: (0, j)),
                           pl.BlockSpec((B, tn), lambda j: (0, j)),
                           pl.BlockSpec((B, tn), lambda j: (0, j)),
                           pl.BlockSpec((B, tn), lambda j: (0, j)),
                           pl.BlockSpec((In, tn), lambda j: (0, j))),
                # In-place: weights, membrane, thresholds, trace_post.
                input_output_aliases={1: 4, 2: 1, 3: 2, 5: 3},
                compiler_params=self._cparams,
            )

            def step(x, w, mem, thr, tr_pre, tr_post):
                tr_pre_new, tr_pre_bf = trace_call(tr_pre, x)
                spk, mem_n, thr_n, tr_post_n, w_n = main_call(
                    x, w, mem, thr, tr_pre_bf, tr_post)
                return spk, mem_n, thr_n, tr_pre_new, tr_post_n, w_n

            return step, (1, 2, 3, 4, 5)

        # ---- gated path (a_pos == a_neg): no dw, no weight writeback ----------
        trace_call = pl.pallas_call(
            functools.partial(_trace_pre_kernel, trace_decay=self.trace_decay),
            out_shape=jax.ShapeDtypeStruct((B, In), jnp.float32),
            grid=(In // ti,),
            in_specs=[pl.BlockSpec((B, ti), lambda j: (0, j)),
                      pl.BlockSpec((B, ti), lambda j: (0, j))],
            out_specs=pl.BlockSpec((B, ti), lambda j: (0, j)),
            input_output_aliases={0: 0},
            compiler_params=self._cparams,
        )

        main_call = pl.pallas_call(
            functools.partial(_lif_train_gated_kernel, **lif_kw),
            out_shape=(jax.ShapeDtypeStruct((B, Out), jnp.bfloat16),   # spikes
                       jax.ShapeDtypeStruct((B, Out), jnp.float32),    # membrane
                       jax.ShapeDtypeStruct((B, Out), jnp.float32),    # thresholds
                       jax.ShapeDtypeStruct((B, Out), jnp.float32)),   # trace_post
            grid=(Out // tn,),
            in_specs=[pl.BlockSpec((B, In), lambda j: (0, 0)),    # x (resident)
                      pl.BlockSpec((In, tn), lambda j: (0, j)),   # weights tile
                      pl.BlockSpec((B, tn), lambda j: (0, j)),    # membrane tile
                      pl.BlockSpec((B, tn), lambda j: (0, j)),    # thresholds tile
                      pl.BlockSpec((B, tn), lambda j: (0, j))],   # trace_post tile
            out_specs=(pl.BlockSpec((B, tn), lambda j: (0, j)),
                       pl.BlockSpec((B, tn), lambda j: (0, j)),
                       pl.BlockSpec((B, tn), lambda j: (0, j)),
                       pl.BlockSpec((B, tn), lambda j: (0, j))),
            input_output_aliases={2: 1, 3: 2, 4: 3},
            compiler_params=self._cparams,
        )

        def step(x, w, mem, thr, tr_pre, tr_post):
            tr_pre_new = trace_call(tr_pre, x)
            spk, mem_n, thr_n, tr_post_n = main_call(x, w, mem, thr, tr_post)
            return spk, mem_n, thr_n, tr_pre_new, tr_post_n

        return step, (2, 3, 4, 5)

    # -- public API --------------------------------------------------------------
    def forward(self, in_spikes, train=True):
        x = jnp.asarray(in_spikes).astype(jnp.bfloat16)   # 0/1 spikes, exact
        if x.shape != (self._B, self._In):
            x = jnp.pad(x, ((0, self._B - x.shape[0]),
                            (0, self._In - x.shape[1])))
        if train:
            if not self._stdp_active and not self._w_clamped:
                # dw is identically zero when a_pos == a_neg, so the reference's
                # per-step clamp reduces to a single idempotent clamp.
                self._weights = jnp.clip(self._weights, -0.1, 0.1)
                self._w_clamped = True
            if self._stdp_active:
                (spk, self._membrane, self._thresholds, self._trace_pre,
                 self._trace_post, self._weights) = self._train_step(
                    x, self._weights, self._membrane, self._thresholds,
                    self._trace_pre, self._trace_post)
            else:
                (spk, self._membrane, self._thresholds, self._trace_pre,
                 self._trace_post) = self._train_step(
                    x, self._weights, self._membrane, self._thresholds,
                    self._trace_pre, self._trace_post)
        else:
            spk, self._membrane, self._thresholds = self._eval_step(
                x, self._weights, self._membrane, self._thresholds)
        self._out_spikes = spk
        return self._slice_bo(spk)

    def _slice_bo(self, a):
        if a.shape == (self.batch_size, self.out_features):
            return a
        return a[: self.batch_size, : self.out_features]

    @property
    def weights(self):
        w = self._weights[: self.in_features, : self.out_features]
        return w.astype(jnp.float32)

    @property
    def membrane(self):
        return self._slice_bo(self._membrane)

    @property
    def thresholds(self):
        return self._slice_bo(self._thresholds)

    @property
    def out_spikes(self):
        return self._slice_bo(self._out_spikes)

    @property
    def trace_pre(self):
        t = self._trace_pre
        if t.shape == (self.batch_size, self.in_features):
            return t
        return t[: self.batch_size, : self.in_features]

    @property
    def trace_post(self):
        return self._slice_bo(self._trace_post)


if __name__ == "__main__":
    # Small, deterministic, lane/sublane-aligned example.
    batch, in_features, out_features = 8, 256, 512
    key = jax.random.PRNGKey(0)
    k_w, k_w2, k_x = jax.random.split(key, 3)

    # Binary input spikes in a narrow dtype.
    in_spikes = jax.random.bernoulli(
        k_x, p=0.3, shape=(batch, in_features)).astype(jnp.bfloat16)

    # Default config (a_pos == a_neg): STDP weight path compiled out; auto tiles.
    layer = STDPLinear(in_features, out_features, batch_size=batch, key=k_w)
    out_train = layer.forward(in_spikes, train=True)
    out_eval = layer.forward(in_spikes, train=False)

    # Non-degenerate STDP config exercises the dw / weight-writeback kernel;
    # tiles forced to 128 so this small demo runs a multi-step, pipelined,
    # megacore-parallel grid.
    layer_stdp = STDPLinear(in_features, out_features, batch_size=batch,
                            a_pos=0.006, a_neg=0.004,
                            tile_n=128, tile_in=128, key=k_w2)
    out_stdp = layer_stdp.forward(in_spikes, train=True)

    jax.block_until_ready((out_train, out_eval, out_stdp))
    jax.block_until_ready(layer_stdp.weights)
    jax.block_until_ready(layer.membrane)

    assert out_train.shape == (batch, out_features)
    assert out_eval.shape == (batch, out_features)
    assert out_stdp.shape == (batch, out_features)
    assert layer.weights.shape == (in_features, out_features)
    print("KERNEL_OK")
</pallas_src>

<mosaic_0001>
module attributes {stable_mosaic.version = 11 : i64} {
  func.func @_lif_train_gated_kernel(%arg0: i32, %arg1: memref<8x256xbf16, #tpu.memory_space<vmem>>, %arg2: memref<256x512xbf16, #tpu.memory_space<vmem>>, %arg3: memref<8x512xf32, #tpu.memory_space<vmem>>, %arg4: memref<8x512xf32, #tpu.memory_space<vmem>>, %arg5: memref<8x512xf32, #tpu.memory_space<vmem>>, %arg6: memref<8x512xbf16, #tpu.memory_space<vmem>>, %arg7: memref<8x512xf32, #tpu.memory_space<vmem>>, %arg8: memref<8x512xf32, #tpu.memory_space<vmem>>, %arg9: memref<8x512xf32, #tpu.memory_space<vmem>>) attributes {dimension_semantics = [#tpu.dimension_semantics<parallel>], iteration_bounds = array<i64: 1>, scalar_prefetch = 0 : i64, scratch_operands = 0 : i64, tpu.core_type = #tpu.core_type<tc>, window_params = [{pipeline_mode = #tpu.pipeline_mode<synchronous>, transform_indices = @transform_0, window_bounds = array<i64: 8, 256>}, {transform_indices = @transform_1, window_bounds = array<i64: 256, 512>}, {transform_indices = @transform_2, window_bounds = array<i64: 8, 512>}, {transform_indices = @transform_3, window_bounds = array<i64: 8, 512>}, {transform_indices = @transform_4, window_bounds = array<i64: 8, 512>}, {transform_indices = @transform_5, window_bounds = array<i64: 8, 512>}, {transform_indices = @transform_6, window_bounds = array<i64: 8, 512>}, {transform_indices = @transform_7, window_bounds = array<i64: 8, 512>}, {transform_indices = @transform_8, window_bounds = array<i64: 8, 512>}]} {
    %c0 = arith.constant 0 : index
    %c0_0 = arith.constant 0 : index
    %0 = vector.load %arg1[%c0, %c0_0] : memref<8x256xbf16, #tpu.memory_space<vmem>>, vector<8x256xbf16>
    %c0_1 = arith.constant 0 : index
    %c0_2 = arith.constant 0 : index
    %1 = vector.load %arg2[%c0_1, %c0_2] : memref<256x512xbf16, #tpu.memory_space<vmem>>, vector<256x512xbf16>
    %c0_3 = arith.constant 0 : index
    %c0_4 = arith.constant 0 : index
    %2 = vector.load %arg3[%c0_3, %c0_4] : memref<8x512xf32, #tpu.memory_space<vmem>>, vector<8x512xf32>
    %c0_5 = arith.constant 0 : index
    %c0_6 = arith.constant 0 : index
    %3 = vector.load %arg4[%c0_5, %c0_6] : memref<8x512xf32, #tpu.memory_space<vmem>>, vector<8x512xf32>
    %cst = arith.constant dense<0.000000e+00> : vector<8x512xf32>
    %4 = tpu.matmul %0, %1, %cst {dimension_numbers = #tpu.dot_dimension_numbers<[1], [0], [0], [1], [0, 0, 1, 1], [], []>} : vector<8x256xbf16>, vector<256x512xbf16>, vector<8x512xf32> -> vector<8x512xf32>
    %cst_7 = arith.constant 9.900000e-01 : f32
    %5 = vector.broadcast %cst_7 : f32 to vector<8x512xf32>
    %6 = arith.mulf %2, %5 : vector<8x512xf32>
    %7 = arith.addf %6, %4 : vector<8x512xf32>
    %8 = arith.cmpf oge, %7, %3 : vector<8x512xf32>
    %9 = arith.extui %8 : vector<8x512xi1> to vector<8x512xi32>
    %10 = arith.sitofp %9 : vector<8x512xi32> to vector<8x512xf32>
    %cst_8 = arith.constant 1.000000e-01 : f32
    %11 = vector.broadcast %cst_8 : f32 to vector<8x512xf32>
    %12 = arith.select %8, %11, %7 : vector<8x512xi1>, vector<8x512xf32>
    %cst_9 = arith.constant 0.949999988 : f32
    %13 = vector.broadcast %cst_9 : f32 to vector<8x512xf32>
    %14 = arith.mulf %3, %13 : vector<8x512xf32>
    %cst_10 = arith.constant 1.000000e+00 : f32
    %15 = vector.broadcast %cst_10 : f32 to vector<8x512xf32>
    %16 = arith.select %8, %15, %14 : vector<8x512xi1>, vector<8x512xf32>
    %17 = arith.truncf %10 : vector<8x512xf32> to vector<8x512xbf16>
    %c0_11 = arith.constant 0 : index
    %c0_12 = arith.constant 0 : index
    %18 = vector.load %arg6[%c0_11, %c0_12] : memref<8x512xbf16, #tpu.memory_space<vmem>>, vector<8x512xbf16>
    tpu.vector_store %arg6[%c0_11, %c0_12], %17 {strides = array<i32>} : memref<8x512xbf16, #tpu.memory_space<vmem>>, vector<8x512xbf16>,
    %c0_13 = arith.constant 0 : index
    %c0_14 = arith.constant 0 : index
    %19 = vector.load %arg7[%c0_13, %c0_14] : memref<8x512xf32, #tpu.memory_space<vmem>>, vector<8x512xf32>
    tpu.vector_store %arg7[%c0_13, %c0_14], %12 {strides = array<i32>} : memref<8x512xf32, #tpu.memory_space<vmem>>, vector<8x512xf32>,
    %c0_15 = arith.constant 0 : index
    %c0_16 = arith.constant 0 : index
    %20 = vector.load %arg8[%c0_15, %c0_16] : memref<8x512xf32, #tpu.memory_space<vmem>>, vector<8x512xf32>
    tpu.vector_store %arg8[%c0_15, %c0_16], %16 {strides = array<i32>} : memref<8x512xf32, #tpu.memory_space<vmem>>, vector<8x512xf32>,
    %c0_17 = arith.constant 0 : index
    %c0_18 = arith.constant 0 : index
    %21 = vector.load %arg5[%c0_17, %c0_18] : memref<8x512xf32, #tpu.memory_space<vmem>>, vector<8x512xf32>
    %cst_19 = arith.constant 0.949999988 : f32
    %22 = vector.broadcast %cst_19 : f32 to vector<8x512xf32>
    %23 = arith.mulf %21, %22 : vector<8x512xf32>
    %24 = arith.addf %23, %10 : vector<8x512xf32>
    %cst_20 = arith.constant 0.000000e+00 : f32
    %cst_21 = arith.constant 1.000000e+00 : f32
    %25 = vector.broadcast %cst_20 : f32 to vector<8x512xf32>
    %26 = arith.maximumf %25, %24 : vector<8x512xf32>
    %27 = vector.broadcast %cst_21 : f32 to vector<8x512xf32>
    %28 = arith.minimumf %27, %26 : vector<8x512xf32>
    %c0_22 = arith.constant 0 : index
    %c0_23 = arith.constant 0 : index
    %29 = vector.load %arg9[%c0_22, %c0_23] : memref<8x512xf32, #tpu.memory_space<vmem>>, vector<8x512xf32>
    tpu.vector_store %arg9[%c0_22, %c0_23], %28 {strides = array<i32>} : memref<8x512xf32, #tpu.memory_space<vmem>>, vector<8x512xf32>,
    return
  }
  func.func @transform_0(%arg0: i32) -> (i32, i32) {
    %c0_i32 = arith.constant 0 : i32
    %c0_i32_0 = arith.constant 0 : i32
    %c0_i32_1 = arith.constant 0 : i32
    return %c0_i32, %c0_i32_0 : i32, i32
  }
  func.func @transform_1(%arg0: i32) -> (i32, i32) {
    %c0_i32 = arith.constant 0 : i32
    %c0_i32_0 = arith.constant 0 : i32
    return %c0_i32, %arg0 : i32, i32
  }
  func.func @transform_2(%arg0: i32) -> (i32, i32) {
    %c0_i32 = arith.constant 0 : i32
    %c0_i32_0 = arith.constant 0 : i32
    return %c0_i32, %arg0 : i32, i32
  }
  func.func @transform_3(%arg0: i32) -> (i32, i32) {
    %c0_i32 = arith.constant 0 : i32
    %c0_i32_0 = arith.constant 0 : i32
    return %c0_i32, %arg0 : i32, i32
  }
  func.func @transform_4(%arg0: i32) -> (i32, i32) {
    %c0_i32 = arith.constant 0 : i32
    %c0_i32_0 = arith.constant 0 : i32
    return %c0_i32, %arg0 : i32, i32
  }
  func.func @transform_5(%arg0: i32) -> (i32, i32) {
    %c0_i32 = arith.constant 0 : i32
    %c0_i32_0 = arith.constant 0 : i32
    return %c0_i32, %arg0 : i32, i32
  }
  func.func @transform_6(%arg0: i32) -> (i32, i32) {
    %c0_i32 = arith.constant 0 : i32
    %c0_i32_0 = arith.constant 0 : i32
    return %c0_i32, %arg0 : i32, i32
  }
  func.func @transform_7(%arg0: i32) -> (i32, i32) {
    %c0_i32 = arith.constant 0 : i32
    %c0_i32_0 = arith.constant 0 : i32
    return %c0_i32, %arg0 : i32, i32
  }
  func.func @transform_8(%arg0: i32) -> (i32, i32) {
    %c0_i32 = arith.constant 0 : i32
    %c0_i32_0 = arith.constant 0 : i32
    return %c0_i32, %arg0 : i32, i32
  }
}

module attributes {stable_mosaic.version = 11 : i64} {
  func.func @_trace_pre_kernel(%arg0: i32, %arg1: memref<8x256xf32, #tpu.memory_space<vmem>>, %arg2: memref<8x256xbf16, #tpu.memory_space<vmem>>, %arg3: memref<8x256xf32, #tpu.memory_space<vmem>>) attributes {dimension_semantics = [#tpu.dimension_semantics<parallel>], iteration_bounds = array<i64: 1>, scalar_prefetch = 0 : i64, scratch_operands = 0 : i64, tpu.core_type = #tpu.core_type<tc>, window_params = [{transform_indices = @transform_0, window_bounds = array<i64: 8, 256>}, {transform_indices = @transform_1, window_bounds = array<i64: 8, 256>}, {transform_indices = @transform_2, window_bounds = array<i64: 8, 256>}]} {
    %c0 = arith.constant 0 : index
    %c0_0 = arith.constant 0 : index
    %0 = vector.load %arg1[%c0, %c0_0] : memref<8x256xf32, #tpu.memory_space<vmem>>, vector<8x256xf32>
    %cst = arith.constant 0.949999988 : f32
    %1 = vector.broadcast %cst : f32 to vector<8x256xf32>
    %2 = arith.mulf %0, %1 : vector<8x256xf32>
    %c0_1 = arith.constant 0 : index
    %c0_2 = arith.constant 0 : index
    %3 = vector.load %arg2[%c0_1, %c0_2] : memref<8x256xbf16, #tpu.memory_space<vmem>>, vector<8x256xbf16>
    %4 = arith.extf %3 : vector<8x256xbf16> to vector<8x256xf32>
    %5 = arith.addf %2, %4 : vector<8x256xf32>
    %cst_3 = arith.constant 0.000000e+00 : f32
    %cst_4 = arith.constant 1.000000e+00 : f32
    %6 = vector.broadcast %cst_3 : f32 to vector<8x256xf32>
    %7 = arith.maximumf %6, %5 : vector<8x256xf32>
    %8 = vector.broadcast %cst_4 : f32 to vector<8x256xf32>
    %9 = arith.minimumf %8, %7 : vector<8x256xf32>
    %c0_5 = arith.constant 0 : index
    %c0_6 = arith.constant 0 : index
    %10 = vector.load %arg3[%c0_5, %c0_6] : memref<8x256xf32, #tpu.memory_space<vmem>>, vector<8x256xf32>
    tpu.vector_store %arg3[%c0_5, %c0_6], %9 {strides = array<i32>} : memref<8x256xf32, #tpu.memory_space<vmem>>, vector<8x256xf32>,
    return
  }
  func.func @transform_0(%arg0: i32) -> (i32, i32) {
    %c0_i32 = arith.constant 0 : i32
    %c0_i32_0 = arith.constant 0 : i32
    return %c0_i32, %arg0 : i32, i32
  }
  func.func @transform_1(%arg0: i32) -> (i32, i32) {
    %c0_i32 = arith.constant 0 : i32
    %c0_i32_0 = arith.constant 0 : i32
    return %c0_i32, %arg0 : i32, i32
  }
  func.func @transform_2(%arg0: i32) -> (i32, i32) {
    %c0_i32 = arith.constant 0 : i32
    %c0_i32_0 = arith.constant 0 : i32
    return %c0_i32, %arg0 : i32, i32
  }
}

</mosaic_0001>

<bundles_post_ra>
// kernel: step.2
= control target key start
LH: loop header
LB: loop body
LE: loop exit
PB: predicated region body
PF: predicated region fallthrough
CT: control target
= control target key end

     0   :  { %7 = vsyncpa [#allocation3], 0  ;;  %s181_s0 = inlined_call_operand.hbm [shape: f32[8,256], index: 0, kind: input, shape index: {}, may-alias: {0,2}]   ;;  %s182_s1 = inlined_call_operand.hbm [shape: bf16[8,256], index: 1, kind: input, shape index: {}]   ;;  %s183_s2 = inlined_call_operand.hbm [shape: f32[8,256], index: 2, kind: output, shape index: {}, may-alias: {0,2}]  }
   0x1   :  { %8 = vsyncpa [#allocation6], 0 }
   0x2   :  { %9 = vsyncpa [#allocation4], 0  ;;  %s15_s11 = sshll.u32 %s181_s0, 4  ;;  %s154_s12 = smov [#allocation2]   ;;  %s16_s11 = int_to_ptr.hbm [resolvable:$true] %s15_s11 }
   0x3   :  { %s17_s13 = sshll.u32 %s154_s12, 4  ;;  %s26_s16 = sshll.u32 %s182_s1, 4  ;;  %s18_s13 = int_to_ptr.vmem [resolvable:$true] %s17_s13  ;;  %s27_s16 = int_to_ptr.hbm [resolvable:$true] %s26_s16 }
   0x4   :  { %20 = dma.hbm_to_vmem [thread:$0]  %s16_s11, 256, %s18_s13, [#allocation3]  }
   0x5   :  { %s155_s17 = smov [#allocation5]  }
   0x6   :  { %s28_s18 = sshll.u32 %s155_s17, 4  ;;  %s29_s18 = int_to_ptr.vmem [resolvable:$true] %s28_s18 }
   0x7   :  { %31 = dma.hbm_to_vmem [thread:$0]  %s27_s16, 128, %s29_s18, [#allocation6]  }
   0x8   :  { %148 = dma.done.wait [#allocation3], 256  }
   0x9   :  { %149 = vsyncadd [#allocation3], 4294967040 }
   0xa   :  { %150 = dma.done.wait [#allocation6], 128  }
   0xb   :  { %151 = vsyncadd [#allocation6], 4294967168  ;;  %v40_v0 = vld [vmem:[#allocation2] sm:$0xff]  ;;  %v44_v1 = vld [vmem:[#allocation5] sm:$0xff]  ;;  %s156_s0 = smov [#allocation7]   ;;  %s62_s21 = sshll.u32 %s183_s2, 4  ;;  %s63_s21 = int_to_ptr.hbm [resolvable:$true] %s62_s21 }
   0xc   :  { %v41_v2 = vld [vmem:[#allocation2 + $0x8] sm:$0xff]  ;;  %v42_v3 = vmul.f32 0.95, %v40_v0  ;;  %v45_v4 = vunpack.c.l.bf16 %v44_v1  ;;  %v46_v6 = vunpack.c.h.bf16 %v44_v1  ;;  %s60_s1 = sshll.u32 %s156_s0, 4  ;;  %s61_s1 = int_to_ptr.vmem [resolvable:$true] %s60_s1 }
   0xd   :  { %v43_v5 = vmul.f32 0.95, %v41_v2 }
   0xe   :  { %v47_v7 = vadd.f32 %v45_v4, %v42_v3 }
   0xf   :  { %v48_v8 = vadd.f32 %v46_v6, %v43_v5 }
  0x10   :  { %v49_v9 = vmax.f32 %v47_v7, 0.0 }
  0x11   :  { %v50_v10 = vmax.f32 %v48_v8, 0.0 }
  0x12   :  { %v51_v11 = vmin.f32 %v49_v9, 1.0 }
  0x13   :  { %v52_v12 = vmin.f32 %v50_v10, 1.0 }
  0x14   :  { %53 = vst [vmem:[#allocation7] sm:$0xff] %v51_v11 }
  0x15   :  { %54 = vst [vmem:[#allocation7 + $0x8] sm:$0xff] %v52_v12 }
  0x16   :  { %65 = dma.vmem_to_hbm [thread:$0]  %s61_s1, 256, %s63_s21, [#allocation4]  }
  0x17   :  { %152 = dma.done.wait [#allocation4], 256  }
  0x18   :  { %153 = vsyncadd [#allocation4], 4294967040 }
  0x19   :  { %70 = vsyncpa [#allocation3], 1 }
  0x1a   :  { %71 = vsyncpa [#allocation6], 1 }
  0x1b   :  { %72 = vsyncpa [#allocation4], 1 }

// kernel: step.3
= control target key start
LH: loop header
LB: loop body
LE: loop exit
PB: predicated region body
PF: predicated region fallthrough
CT: control target
= control target key end

     0   :  { %14 = vsyncpa [#allocation3], 0  ;;  %s1407_s0 = inlined_call_operand.hbm [shape: bf16[8,256], index: 0, kind: input, shape index: {}]   ;;  %s1408_s1 = inlined_call_operand.hbm [shape: bf16[256,512], index: 1, kind: input, shape index: {}]   ;;  %s1409_s2 = inlined_call_operand.hbm [shape: f32[8,512], index: 2, kind: input, shape index: {}, may-alias: {2,6}]   ;;  %s1410_s3 = inlined_call_operand.hbm [shape: f32[8,512], index: 3, kind: input, shape index: {}, may-alias: {3,7}]   ;;  %s1411_s4 = inlined_call_operand.hbm [shape: f32[8,512], index: 4, kind: input, shape index: {}, may-alias: {4,8}]   ;;  %s1412_s5 = inlined_call_operand.hbm [shape: bf16[8,512], index: 5, kind: output, shape index: {0}]   ;;  %s1413_s6 = inlined_call_operand.hbm [shape: f32[8,512], index: 6, kind: output, shape index: {1}, may-alias: {2,6}]   ;;  %s1414_s7 = inlined_call_operand.hbm [shape: f32[8,512], index: 7, kind: output, shape index: {2}, may-alias: {3,7}]   ;;  %s1415_s8 = inlined_call_operand.hbm [shape: f32[8,512], index: 8, kind: output, shape index: {3}, may-alias: {4,8}]  }
   0x1   :  { %15 = vsyncpa [#allocation6], 0 }
   0x2   :  { %16 = vsyncpa [#allocation9], 0 }
   0x3   :  { %17 = vsyncpa [#allocation4], 0 }
   0x4   :  { %18 = vsyncpa [#allocation13], 0  ;;  %s35_s29 = sshll.u32 %s1408_s1, 4  ;;  %s36_s29 = int_to_ptr.hbm [resolvable:$true] %s35_s29 }
   0x5   :  { %19 = vsyncpa [#allocation16], 0  ;;  %s1299_s30 = smov [#allocation5]   ;;  %s60_s12 = sshll.u32 %s1410_s3, 4  ;;  %s61_s12 = int_to_ptr.hbm [resolvable:$true] %s60_s12 }
   0x6   :  { %s37_s9 = sshll.u32 %s1299_s30, 4  ;;  %s1300_s13 = smov 256   ;;  %s38_s9 = int_to_ptr.vmem [resolvable:$true] %s37_s9 }
   0x7   :  { %s1301_s14 = smov 16   ;;  %s1302_s15 = smov [#allocation8]  }
   0x8   :  { %43 = dma.hbm_to_vmem [thread:$0]  %s36_s29, 8192, %s38_s9, [#allocation6], %s1300_s13, %s1300_s13, %s1301_s14  }
   0x9   :  { %s62_s16 = sshll.u32 %s1302_s15, 4  ;;  %s25_s19 = sshll.u32 %s1407_s0, 4  ;;  %s63_s16 = int_to_ptr.vmem [resolvable:$true] %s62_s16  ;;  %s26_s19 = int_to_ptr.hbm [resolvable:$true] %s25_s19 }
   0xa   :  { %65 = dma.hbm_to_vmem [thread:$0]  %s61_s12, 512, %s63_s16, [#allocation9]  }
   0xb   :  { %s49_s21 = sshll.u32 %s1409_s2, 4  ;;  %s1303_s22 = smov [#allocation2]   ;;  %s50_s21 = int_to_ptr.hbm [resolvable:$true] %s49_s21 }
   0xc   :  { %s27_s23 = sshll.u32 %s1303_s22, 4  ;;  %s1304_s3 = smov [#allocation7]   ;;  %s28_s23 = int_to_ptr.vmem [resolvable:$true] %s27_s23 }
   0xd   :  { %30 = dma.hbm_to_vmem [thread:$0]  %s26_s19, 128, %s28_s23, [#allocation3]  }
   0xe   :  { %s51_s24 = sshll.u32 %s1304_s3, 4  ;;  %s71_s27 = sshll.u32 %s1411_s4, 4  ;;  %s52_s24 = int_to_ptr.vmem [resolvable:$true] %s51_s24  ;;  %s72_s27 = int_to_ptr.hbm [resolvable:$true] %s71_s27 }
   0xf   :  { %54 = dma.hbm_to_vmem [thread:$0]  %s50_s21, 512, %s52_s24, [#allocation6]  }
  0x10   :  { %s1305_s0 = smov [#allocation10]  }
  0x11   :  { %s73_s28 = sshll.u32 %s1305_s0, 4  ;;  %s74_s28 = int_to_ptr.vmem [resolvable:$true] %s73_s28 }
  0x12   :  { %76 = dma.hbm_to_vmem [thread:$0]  %s72_s27, 512, %s74_s28, [#allocation9]  }
  0x13   :  { %1287 = dma.done.wait [#allocation3], 128  }
  0x14   :  { %1288 = vsyncadd [#allocation3], 4294967168 }
  0x15   :  { %1289 = dma.done.wait [#allocation6], 8704  }
  0x16   :  { %1290 = vsyncadd [#allocation6], 4294958592 }
  0x17   :  { %1291 = dma.done.wait [#allocation9], 1024  }
  0x18   :  { %1292 = vsyncadd [#allocation9], 4294966272  ;;  %v849_v0 = vld [vmem:[#allocation5 + $0xe0] sm:$0xf]  ;;  %v1025_v1 = vld [vmem:[#allocation5 + $0xec] sm:$0xf0] }
  0x19   :  { %v977_v2 = vld [vmem:[#allocation5 + $0x1e0] sm:$0xf]  ;;  %v850_v3 = vor.u32 %v1025_v1, %v849_v0  ;;  %v1057_v4 = vld [vmem:[#allocation5 + $0x1ec] sm:$0xf0]  ;;  %v1023_v5 = vld [vmem:[#allocation5 + $0xe4] sm:$0xf] }
  0x1a   :  { %v851_v6 = vld [vmem:[#allocation5 + $0xf0] sm:$0xf0]  ;;  %v978_v7 = vor.u32 %v1057_v4, %v977_v2  ;;  %v1055_v9 = vld [vmem:[#allocation5 + $0x1e4] sm:$0xf]  ;;  %v833_v11 = vld [vmem:[#allocation5 + $0xc0] sm:$0xf] }
  0x1b   :  { %v854_v8 = vor.u32 %v1023_v5, %v851_v6  ;;  %v979_v10 = vld [vmem:[#allocation5 + $0x1f0] sm:$0xf0]  ;;  %497 = vmatpush.bf16.msra.mxu0 %v850_v3  ;;  %v1021_v13 = vld [vmem:[#allocation5 + $0xcc] sm:$0xf0]  ;;  %v961_v14 = vld [vmem:[#allocation5 + $0x1c0] sm:$0xf] }
  0x1c   :  { %v982_v12 = vor.u32 %v1055_v9, %v979_v10  ;;  %v1053_v15 = vld [vmem:[#allocation5 + $0x1cc] sm:$0xf0]  ;;  %510 = vmatpush.bf16.msra.mxu1 %v978_v7  ;;  %v834_v16 = vor.u32 %v1021_v13, %v833_v11  ;;  %v1019_v18 = vld [vmem:[#allocation5 + $0xc4] sm:$0xf]  ;;  %v835_v19 = vld [vmem:[#allocation5 + $0xd0] sm:$0xf0] }
  0x1d   :  { %523 = vmatpush.bf16.msra.mxu2 %v854_v8  ;;  %v962_v17 = vor.u32 %v1053_v15, %v961_v14  ;;  %v1051_v20 = vld [vmem:[#allocation5 + $0x1c4] sm:$0xf]  ;;  %v838_v21 = vor.u32 %v1019_v18, %v835_v19  ;;  %v963_v22 = vld [vmem:[#allocation5 + $0x1d0] sm:$0xf0]  ;;  %v817_v23 = vld [vmem:[#allocation5 + $0xa0] sm:$0xf] }
  0x1e   :  { %536 = vmatpush.bf16.msra.mxu3 %v982_v12  ;;  %v1017_v24 = vld [vmem:[#allocation5 + $0xac] sm:$0xf0]  ;;  %v966_v25 = vor.u32 %v1051_v20, %v963_v22  ;;  %v945_v26 = vld [vmem:[#allocation5 + $0x1a0] sm:$0xf]  ;;  %v1015_v28 = vld [vmem:[#allocation5 + $0xa4] sm:$0xf] }
  0x1f   :  { %v1049_v27 = vld [vmem:[#allocation5 + $0x1ac] sm:$0xf0]  ;;  %498 = vmatpush.bf16.msra.mxu0 %v834_v16  ;;  %v818_v29 = vor.u32 %v1017_v24, %v817_v23  ;;  %v819_v30 = vld [vmem:[#allocation5 + $0xb0] sm:$0xf0]  ;;  %v1047_v31 = vld [vmem:[#allocation5 + $0x1a4] sm:$0xf] }
  0x20   :  { %v947_v32 = vld [vmem:[#allocation5 + $0x1b0] sm:$0xf0]  ;;  %511 = vmatpush.bf16.msra.mxu1 %v962_v17  ;;  %v946_v33 = vor.u32 %v1049_v27, %v945_v26  ;;  %v822_v34 = vor.u32 %v1015_v28, %v819_v30  ;;  %v801_v35 = vld [vmem:[#allocation5 + $0x80] sm:$0xf]  ;;  %v1013_v36 = vld [vmem:[#allocation5 + $0x8c] sm:$0xf0] }
  0x21   :  { %524 = vmatpush.bf16.msra.mxu2 %v838_v21  ;;  %v929_v37 = vld [vmem:[#allocation5 + $0x180] sm:$0xf]  ;;  %v950_v38 = vor.u32 %v1047_v31, %v947_v32  ;;  %v1045_v39 = vld [vmem:[#allocation5 + $0x18c] sm:$0xf0]  ;;  %v1011_v40 = vld [vmem:[#allocation5 + $0x84] sm:$0xf]  ;;  %v802_v44 = vor.u32 %v1013_v36, %v801_v35 }
  0x22   :  { %537 = vmatpush.bf16.msra.mxu3 %v966_v25  ;;  %v803_v41 = vld [vmem:[#allocation5 + $0x90] sm:$0xf0]  ;;  %v1043_v42 = vld [vmem:[#allocation5 + $0x184] sm:$0xf]  ;;  %v930_v45 = vor.u32 %v1045_v39, %v929_v37  ;;  %v785_v47 = vld [vmem:[#allocation5 + $0x60] sm:$0xf] }
  0x23   :  { %v931_v43 = vld [vmem:[#allocation5 + $0x190] sm:$0xf0]  ;;  %499 = vmatpush.bf16.msra.mxu0 %v818_v29  ;;  %v806_v46 = vor.u32 %v1011_v40, %v803_v41  ;;  %v1009_v48 = vld [vmem:[#allocation5 + $0x6c] sm:$0xf0]  ;;  %v913_v49 = vld [vmem:[#allocation5 + $0x160] sm:$0xf] }
  0x24   :  { %512 = vmatpush.bf16.msra.mxu1 %v946_v33  ;;  %v934_v50 = vor.u32 %v1043_v42, %v931_v43  ;;  %v1041_v51 = vld [vmem:[#allocation5 + $0x16c] sm:$0xf0]  ;;  %v1007_v52 = vld [vmem:[#allocation5 + $0x64] sm:$0xf]  ;;  %v787_v53 = vld [vmem:[#allocation5 + $0x70] sm:$0xf0]  ;;  %v786_v56 = vor.u32 %v1009_v48, %v785_v47 }
  0x25   :  { %525 = vmatpush.bf16.msra.mxu2 %v822_v34  ;;  %v1039_v54 = vld [vmem:[#allocation5 + $0x164] sm:$0xf]  ;;  %v915_v55 = vld [vmem:[#allocation5 + $0x170] sm:$0xf0]  ;;  %v914_v57 = vor.u32 %v1041_v51, %v913_v49  ;;  %v790_v58 = vor.u32 %v1007_v52, %v787_v53  ;;  %v769_v59 = vld [vmem:[#allocation5 + $0x40] sm:$0xf] }
  0x26   :  { %538 = vmatpush.bf16.msra.mxu3 %v950_v38  ;;  %v1005_v60 = vld [vmem:[#allocation5 + $0x4c] sm:$0xf0]  ;;  %v897_v61 = vld [vmem:[#allocation5 + $0x140] sm:$0xf]  ;;  %v918_v62 = vor.u32 %v1039_v54, %v915_v55  ;;  %v1003_v0 = vld [vmem:[#allocation5 + $0x44] sm:$0xf] }
  0x27   :  { %500 = vmatpush.bf16.msra.mxu0 %v802_v44  ;;  %v1037_v63 = vld [vmem:[#allocation5 + $0x14c] sm:$0xf0]  ;;  %v771_v1 = vld [vmem:[#allocation5 + $0x50] sm:$0xf0]  ;;  %v1035_v2 = vld [vmem:[#allocation5 + $0x144] sm:$0xf]  ;;  %v770_v4 = vor.u32 %v1005_v60, %v769_v59 }
  0x28   :  { %513 = vmatpush.bf16.msra.mxu1 %v930_v45  ;;  %v899_v3 = vld [vmem:[#allocation5 + $0x150] sm:$0xf0]  ;;  %v898_v5 = vor.u32 %v1037_v63, %v897_v61  ;;  %v774_v6 = vor.u32 %v1003_v0, %v771_v1  ;;  %v753_v7 = vld [vmem:[#allocation5 + $0x20] sm:$0xf]  ;;  %v1001_v8 = vld [vmem:[#allocation5 + $0x2c] sm:$0xf0] }
  0x29   :  { %526 = vmatpush.bf16.msra.mxu2 %v806_v46  ;;  %v881_v9 = vld [vmem:[#allocation5 + $0x120] sm:$0xf]  ;;  %v902_v10 = vor.u32 %v1035_v2, %v899_v3  ;;  %v1033_v11 = vld [vmem:[#allocation5 + $0x12c] sm:$0xf0]  ;;  %v999_v12 = vld [vmem:[#allocation5 + $0x24] sm:$0xf]  ;;  %v754_v16 = vor.u32 %v1001_v8, %v753_v7 }
  0x2a   :  { %539 = vmatpush.bf16.msra.mxu3 %v934_v50  ;;  %v755_v13 = vld [vmem:[#allocation5 + $0x30] sm:$0xf0]  ;;  %v1031_v14 = vld [vmem:[#allocation5 + $0x124] sm:$0xf]  ;;  %v737_v17 = vld [vmem:[#allocation5] sm:$0xf]  ;;  %v882_v20 = vor.u32 %v1033_v11, %v881_v9 }
  0x2b   :  { %501 = vmatpush.bf16.msra.mxu0 %v786_v56  ;;  %v883_v15 = vld [vmem:[#allocation5 + $0x130] sm:$0xf0]  ;;  %v997_v18 = vld [vmem:[#allocation5 + $0xc] sm:$0xf0]  ;;  %v865_v19 = vld [vmem:[#allocation5 + $0x100] sm:$0xf]  ;;  %v758_v21 = vor.u32 %v999_v12, %v755_v13 }
  0x2c   :  { %514 = vmatpush.bf16.msra.mxu1 %v914_v57  ;;  %v1029_v22 = vld [vmem:[#allocation5 + $0x10c] sm:$0xf0]  ;;  %v995_v23 = vld [vmem:[#allocation5 + $0x4] sm:$0xf]  ;;  %v739_v24 = vld [vmem:[#allocation5 + $0x10] sm:$0xf0]  ;;  %v886_v25 = vor.u32 %v1031_v14, %v883_v15  ;;  %v738_v32 = vor.u32 %v997_v18, %v737_v17 }
  0x2d   :  { %527 = vmatpush.bf16.msra.mxu2 %v790_v58  ;;  %v1027_v26 = vld [vmem:[#allocation5 + $0x104] sm:$0xf]  ;;  %v867_v27 = vld [vmem:[#allocation5 + $0x110] sm:$0xf0]  ;;  %v857_v28 = vld [vmem:[#allocation5 + $0xe8] sm:$0xf]  ;;  %v866_v37 = vor.u32 %v1029_v22, %v865_v19  ;;  %v742_v38 = vor.u32 %v995_v23, %v739_v24 }
  0x2e   :  { %540 = vmatpush.bf16.msra.mxu3 %v918_v62  ;;  %v1026_v29 = vld [vmem:[#allocation5 + $0xf4] sm:$0xf0]  ;;  %v985_v30 = vld [vmem:[#allocation5 + $0x1e8] sm:$0xf]  ;;  %v1024_v34 = vld [vmem:[#allocation5 + $0xec] sm:$0xf]  ;;  %v870_v42 = vor.u32 %v1027_v26, %v867_v27 }
  0x2f   :  { %502 = vmatpush.bf16.msra.mxu0 %v770_v4  ;;  %v97_v31 = vld [vmem:[#allocation2] sm:$0xff]  ;;  %v1056_v39 = vld [vmem:[#allocation5 + $0x1ec] sm:$0xf]  ;;  %v858_v43 = vor.u32 %v1026_v29, %v857_v28  ;;  %v841_v46 = vld [vmem:[#allocation5 + $0xc8] sm:$0xf]  ;;  %s1307_s2 = smov [#allocation12]  }
  0x30   :  { %515 = vmatpush.bf16.msra.mxu1 %v898_v5  ;;  %v1058_v33 = vld [vmem:[#allocation5 + $0x1f4] sm:$0xf0]  ;;  %v859_v35 = vld [vmem:[#allocation5 + $0xf8] sm:$0xf0]  ;;  %v171_v36 = vunpack.c.l.b16 %v97_v31  ;;  %v172_v41 = vunpack.c.h.b16 %v97_v31  ;;  %v969_v48 = vld [vmem:[#allocation5 + $0x1c8] sm:$0xf] }
  0x31   :  { %528 = vmatpush.bf16.msra.mxu2 %v774_v6  ;;  %v987_v40 = vld [vmem:[#allocation5 + $0x1f8] sm:$0xf0]  ;;  %v986_v44 = vor.u32 %v1058_v33, %v985_v30  ;;  %v862_v45 = vor.u32 %v1024_v34, %v859_v35  ;;  %v1022_v47 = vld [vmem:[#allocation5 + $0xd4] sm:$0xf0]  ;;  %v1020_v51 = vld [vmem:[#allocation5 + $0xcc] sm:$0xf] }
  0x32   :  { %541 = vmatpush.bf16.msra.mxu3 %v902_v10  ;;  %v990_v49 = vor.u32 %v1056_v39, %v987_v40  ;;  %v1054_v50 = vld [vmem:[#allocation5 + $0x1d4] sm:$0xf0]  ;;  %v843_v52 = vld [vmem:[#allocation5 + $0xd8] sm:$0xf0]  ;;  %v1371_v53 = vpack.c.b16 %v171_v36, %v171_v36  ;;  %v1052_v54 = vld [vmem:[#allocation5 + $0x1cc] sm:$0xf]  ;;  %v1373_v56 = vpack.c.b16 %v172_v41, %v172_v41  ;;  %v842_v57 = vor.u32 %v1022_v47, %v841_v46 }
  0x33   :  { %503 = vmatpush.bf16.msra.mxu0 %v754_v16  ;;  %v971_v55 = vld [vmem:[#allocation5 + $0x1d8] sm:$0xf0]  ;;  %v970_v58 = vor.u32 %v1054_v50, %v969_v48  ;;  %v846_v59 = vor.u32 %v1020_v51, %v843_v52  ;;  %v825_v60 = vld [vmem:[#allocation5 + $0xa8] sm:$0xf]  ;;  %v1018_v61 = vld [vmem:[#allocation5 + $0xb4] sm:$0xf0] }
  0x34   :  { %516 = vmatpush.bf16.msra.mxu1 %v882_v20  ;;  %v953_v62 = vld [vmem:[#allocation5 + $0x1a8] sm:$0xf]  ;;  %v974_v63 = vor.u32 %v1052_v54, %v971_v55  ;;  %v1050_v0 = vld [vmem:[#allocation5 + $0x1b4] sm:$0xf0]  ;;  %v1016_v1 = vld [vmem:[#allocation5 + $0xac] sm:$0xf]  ;;  %v826_v5 = vor.u32 %v1018_v61, %v825_v60 }
  0x35   :  { %529 = vmatpush.bf16.msra.mxu2 %v758_v21  ;;  %v827_v2 = vld [vmem:[#allocation5 + $0xb8] sm:$0xf0]  ;;  %v1048_v3 = vld [vmem:[#allocation5 + $0x1ac] sm:$0xf]  ;;  %v954_v6 = vor.u32 %v1050_v0, %v953_v62  ;;  %v809_v8 = vld [vmem:[#allocation5 + $0x88] sm:$0xf] }
  0x36   :  { %542 = vmatpush.bf16.msra.mxu3 %v886_v25  ;;  %v955_v4 = vld [vmem:[#allocation5 + $0x1b8] sm:$0xf0]  ;;  %v830_v7 = vor.u32 %v1016_v1, %v827_v2  ;;  %v1014_v9 = vld [vmem:[#allocation5 + $0x94] sm:$0xf0]  ;;  %v937_v10 = vld [vmem:[#allocation5 + $0x188] sm:$0xf] }
  0x37   :  { %504 = vmatpush.bf16.msra.mxu0 %v738_v32  ;;  %v958_v11 = vor.u32 %v1048_v3, %v955_v4  ;;  %v1046_v12 = vld [vmem:[#allocation5 + $0x194] sm:$0xf0]  ;;  %v1012_v13 = vld [vmem:[#allocation5 + $0x8c] sm:$0xf]  ;;  %v811_v14 = vld [vmem:[#allocation5 + $0x98] sm:$0xf0]  ;;  %v810_v17 = vor.u32 %v1014_v9, %v809_v8 }
  0x38   :  { %517 = vmatpush.bf16.msra.mxu1 %v866_v37  ;;  %v1044_v15 = vld [vmem:[#allocation5 + $0x18c] sm:$0xf]  ;;  %v939_v16 = vld [vmem:[#allocation5 + $0x198] sm:$0xf0]  ;;  %v938_v18 = vor.u32 %v1046_v12, %v937_v10  ;;  %v814_v19 = vor.u32 %v1012_v13, %v811_v14  ;;  %v793_v20 = vld [vmem:[#allocation5 + $0x68] sm:$0xf] }
  0x39   :  { %530 = vmatpush.bf16.msra.mxu2 %v742_v38  ;;  %v1010_v21 = vld [vmem:[#allocation5 + $0x74] sm:$0xf0]  ;;  %v921_v22 = vld [vmem:[#allocation5 + $0x168] sm:$0xf]  ;;  %v942_v23 = vor.u32 %v1044_v15, %v939_v16  ;;  %v1008_v25 = vld [vmem:[#allocation5 + $0x6c] sm:$0xf] }
  0x3a   :  { %543 = vmatpush.bf16.msra.mxu3 %v870_v42  ;;  %505 = vmatmul.bf16.vlgmr.msra.gmra.mxu0 %v1371_v53  ;;  %v1042_v24 = vld [vmem:[#allocation5 + $0x174] sm:$0xf0]  ;;  %v795_v26 = vld [vmem:[#allocation5 + $0x78] sm:$0xf0]  ;;  %v1040_v27 = vld [vmem:[#allocation5 + $0x16c] sm:$0xf]  ;;  %v794_v29 = vor.u32 %v1010_v21, %v793_v20 }
  0x3b   :  { %549 = vmatpush.bf16.msrb.mxu0 %v858_v43  ;;  %518 = vmatmul.bf16.vlgmr.msra.gmra.mxu1 %v1373_v56  ;;  %v923_v28 = vld [vmem:[#allocation5 + $0x178] sm:$0xf0]  ;;  %v922_v30 = vor.u32 %v1042_v24, %v921_v22  ;;  %v798_v31 = vor.u32 %v1008_v25, %v795_v26  ;;  %v777_v32 = vld [vmem:[#allocation5 + $0x48] sm:$0xf]  ;;  %v1006_v33 = vld [vmem:[#allocation5 + $0x54] sm:$0xf0] }
  0x3c   :  { %562 = vmatpush.bf16.msrb.mxu1 %v986_v44  ;;  %531 = vmatmul.bf16.vlgmr.msra.gmra.mxu2 %v1371_v53  ;;  %v905_v34 = vld [vmem:[#allocation5 + $0x148] sm:$0xf]  ;;  %v926_v35 = vor.u32 %v1040_v27, %v923_v28  ;;  %v1038_v36 = vld [vmem:[#allocation5 + $0x154] sm:$0xf0]  ;;  %v1004_v37 = vld [vmem:[#allocation5 + $0x4c] sm:$0xf]  ;;  %v778_v41 = vor.u32 %v1006_v33, %v777_v32 }
  0x3d   :  { %575 = vmatpush.bf16.msrb.mxu2 %v862_v45  ;;  %544 = vmatmul.bf16.vlgmr.msra.gmra.mxu3 %v1373_v56  ;;  %v779_v38 = vld [vmem:[#allocation5 + $0x58] sm:$0xf0]  ;;  %v1036_v39 = vld [vmem:[#allocation5 + $0x14c] sm:$0xf]  ;;  %v906_v42 = vor.u32 %v1038_v36, %v905_v34  ;;  %v761_v44 = vld [vmem:[#allocation5 + $0x28] sm:$0xf] }
  0x3e   :  { %588 = vmatpush.bf16.msrb.mxu3 %v990_v49  ;;  %v907_v40 = vld [vmem:[#allocation5 + $0x158] sm:$0xf0]  ;;  %v782_v43 = vor.u32 %v1004_v37, %v779_v38  ;;  %v1002_v45 = vld [vmem:[#allocation5 + $0x34] sm:$0xf0]  ;;  %v889_v46 = vld [vmem:[#allocation5 + $0x128] sm:$0xf] }
  0x3f   :  { %550 = vmatpush.bf16.msrb.mxu0 %v842_v57  ;;  %v910_v47 = vor.u32 %v1036_v39, %v907_v40  ;;  %v1034_v48 = vld [vmem:[#allocation5 + $0x134] sm:$0xf0]  ;;  %v1000_v49 = vld [vmem:[#allocation5 + $0x2c] sm:$0xf]  ;;  %v763_v50 = vld [vmem:[#allocation5 + $0x38] sm:$0xf0]  ;;  %v762_v54 = vor.u32 %v1002_v45, %v761_v44 }
  0x40   :  { %563 = vmatpush.bf16.msrb.mxu1 %v970_v58  ;;  %v1032_v51 = vld [vmem:[#allocation5 + $0x12c] sm:$0xf]  ;;  %v891_v52 = vld [vmem:[#allocation5 + $0x138] sm:$0xf0]  ;;  %v890_v55 = vor.u32 %v1034_v48, %v889_v46  ;;  %v766_v57 = vor.u32 %v1000_v49, %v763_v50  ;;  %v745_v58 = vld [vmem:[#allocation5 + $0x8] sm:$0xf] }
  0x41   :  { %576 = vmatpush.bf16.msrb.mxu2 %v846_v59  ;;  %v998_v59 = vld [vmem:[#allocation5 + $0x14] sm:$0xf0]  ;;  %v873_v60 = vld [vmem:[#allocation5 + $0x108] sm:$0xf]  ;;  %v894_v61 = vor.u32 %v1032_v51, %v891_v52  ;;  %v747_v0 = vld [vmem:[#allocation5 + $0x18] sm:$0xf0] }
  0x42   :  { %589 = vmatpush.bf16.msrb.mxu3 %v974_v63  ;;  %v1030_v62 = vld [vmem:[#allocation5 + $0x114] sm:$0xf0]  ;;  %v996_v63 = vld [vmem:[#allocation5 + $0xc] sm:$0xf]  ;;  %v875_v2 = vld [vmem:[#allocation5 + $0x118] sm:$0xf0]  ;;  %v746_v3 = vor.u32 %v998_v59, %v745_v58 }
  0x43   :  { %551 = vmatpush.bf16.msrb.mxu0 %v826_v5  ;;  %v1028_v1 = vld [vmem:[#allocation5 + $0x10c] sm:$0xf]  ;;  %v874_v4 = vor.u32 %v1030_v62, %v873_v60  ;;  %v750_v5 = vor.u32 %v996_v63, %v747_v0  ;;  %v166_v9 = vld [vmem:[#allocation8] sm:$0xff]  ;;  %v168_v45 = vld [vmem:[#allocation8 + $0x10] sm:$0xff]  ;;  %s1385_s4 = sshll.u32 %s1307_s2, 4  ;;  %s687_s9 = sshll.u32 %s1413_s6, 4  ;;  %s686_s4 = int_to_ptr.vmem [resolvable:$true] %s1385_s4  ;;  %s688_s9 = int_to_ptr.hbm [resolvable:$true] %s687_s9 }
  0x44   :  { %564 = vmatpush.bf16.msrb.mxu1 %v954_v6  ;;  %v878_v6 = vor.u32 %v1028_v1, %v875_v2  ;;  %v645_v12 = vld [vmem:[#allocation10] sm:$0xff]  ;;  %v163_v14 = vld [vmem:[#allocation7 + $0x8] sm:$0xff]  ;;  %v625_v15 = vmul.f32 0.95, %v166_v9  ;;  %v647_v48 = vld [vmem:[#allocation10 + $0x10] sm:$0xff]  ;;  %s1308_s10 = smov [#allocation11]  }
  0x45   :  { %577 = vmatpush.bf16.msrb.mxu2 %v830_v7  ;;  %v162_v7 = vld [vmem:[#allocation7] sm:$0xff]  ;;  %v602_v20 = vmul.f32 0.99, %v163_v14  ;;  %v646_v22 = vld [vmem:[#allocation10 + $0x8] sm:$0xff]  ;;  %v627_v50 = vmul.f32 0.95, %v168_v45 }
  0x46   :  { %590 = vmatpush.bf16.msrb.mxu3 %v958_v11  ;;  %v601_v10 = vmul.f32 0.99, %v162_v7  ;;  %v165_v51 = vld [vmem:[#allocation7 + $0x18] sm:$0xff]  ;;  %s1392_s11 = sshll.u32 %s1308_s10, 4  ;;  %s676_s14 = sshll.u32 %s1412_s5, 4  ;;  %s675_s11 = int_to_ptr.vmem [resolvable:$true] %s1392_s11  ;;  %s677_s14 = int_to_ptr.hbm [resolvable:$true] %s676_s14 }
  0x47   :  { %552 = vmatpush.bf16.msrb.mxu0 %v810_v17  ;;  %v649_v17 = vmul.f32 0.95, %v645_v12  ;;  %v648_v0 = vld [vmem:[#allocation10 + $0x18] sm:$0xff]  ;;  %s1309_s15 = smov [#allocation14]   ;;  %s698_s19 = sshll.u32 %s1414_s7, 4  ;;  %s699_s19 = int_to_ptr.hbm [resolvable:$true] %s698_s19 }
  0x48   :  { %565 = vmatpush.bf16.msrb.mxu1 %v938_v18  ;;  %v652_v7 = vmul.f32 0.95, %v648_v0  ;;  %s696_s16 = sshll.u32 %s1309_s15, 4  ;;  %s1310_s5 = smov [#allocation15]   ;;  %s697_s16 = int_to_ptr.vmem [resolvable:$true] %s696_s16 }
  0x49   :  { %578 = vmatpush.bf16.msrb.mxu2 %v814_v19  ;;  %v167_v19 = vld [vmem:[#allocation8 + $0x8] sm:$0xff]  ;;  %s707_s6 = sshll.u32 %s1310_s5, 4  ;;  %s709_s20 = sshll.u32 %s1415_s8, 4  ;;  %s708_s6 = int_to_ptr.vmem [resolvable:$true] %s707_s6  ;;  %s710_s20 = int_to_ptr.hbm [resolvable:$true] %s709_s20 }
  0x4a   :  { %591 = vmatpush.bf16.msrb.mxu3 %v942_v23  ;;  %v626_v27 = vmul.f32 0.95, %v167_v19 }
  0x4b   :  { %553 = vmatpush.bf16.msrb.mxu0 %v794_v29 }
  0x4c   :  { %566 = vmatpush.bf16.msrb.mxu1 %v922_v30  ;;  %v650_v30 = vmul.f32 0.95, %v646_v22 }
  0x4d   :  { %579 = vmatpush.bf16.msrb.mxu2 %v798_v31 }
  0x4e   :  { %592 = vmatpush.bf16.msrb.mxu3 %v926_v35 }
  0x4f   :  { %554 = vmatpush.bf16.msrb.mxu0 %v778_v41 }
  0x50   :  { %567 = vmatpush.bf16.msrb.mxu1 %v906_v42 }
  0x51   :  { %580 = vmatpush.bf16.msrb.mxu2 %v782_v43  ;;  %v164_v43 = vld [vmem:[#allocation7 + $0x10] sm:$0xff] }
  0x52   :  { %593 = vmatpush.bf16.msrb.mxu3 %v910_v47  ;;  %v603_v46 = vmul.f32 0.99, %v164_v43 }
  0x53   :  { %555 = vmatpush.bf16.msrb.mxu0 %v762_v54  ;;  %v651_v54 = vmul.f32 0.95, %v647_v48 }
  0x54   :  { %568 = vmatpush.bf16.msrb.mxu1 %v890_v55  ;;  %v604_v55 = vmul.f32 0.99, %v165_v51 }
  0x55   :  { %581 = vmatpush.bf16.msrb.mxu2 %v766_v57 }
  0x56   :  { %594 = vmatpush.bf16.msrb.mxu3 %v894_v61  ;;  %v169_v61 = vld [vmem:[#allocation8 + $0x18] sm:$0xff] }
  0x57   :  { %556 = vmatpush.bf16.msrb.mxu0 %v746_v3 }
  0x58   :  { %569 = vmatpush.bf16.msrb.mxu1 %v874_v4 }
  0x59   :  { %582 = vmatpush.bf16.msrb.mxu2 %v750_v5  ;;  %v628_v5 = vmul.f32 0.95, %v169_v61 }
  0x5a   :  { %595 = vmatpush.bf16.msrb.mxu3 %v878_v6  ;;  %557 = vmatmul.bf16.vlgmr.msrb.gmra.mxu0 %v1371_v53 }
  0x5b   :  { %570 = vmatmul.bf16.vlgmr.msrb.gmra.mxu1 %v1373_v56 }
  0x5c   :  { %583 = vmatmul.bf16.vlgmr.msrb.gmra.mxu2 %v1371_v53  ;;  %v1306_v53 = vmov 0.0  }
  0x5d   :  { %596 = vmatmul.bf16.vlgmr.msrb.gmra.mxu3 %v1373_v56 }
  0xb7   :  { %v506_v8 = vpop.f32.mrf.mxu0 }
  0xb8   :  { %v519_v11 = vpop.f32.mrf.mxu1 }
  0xb9   :  { %v520_v13 = vadd.f32 %v519_v11, %v506_v8 }
  0xbb   :  { %v605_v16 = vadd.f32 %v601_v10, %v520_v13 }
  0xbd   :  { %vm609_vm0 = vcmp.ge.f32.partialorder %v605_v16, %v166_v9 }
  0xbe   :  { %v991_v56 = vsel %vm609_vm0, 1.0, %v1306_v53  ;;  %v621_v23 = vsel %vm609_vm0, 0.1, %v605_v16  ;;  %v629_v24 = vsel %vm609_vm0, 1.0, %v625_v15 }
  0xbf   :  { %v532_v18 = vpop.f32.mrf.mxu2  ;;  %637 = vst [vmem:[#allocation12] sm:$0xff] %v621_v23  ;;  %v653_v26 = vadd.f32 %v991_v56, %v649_v17  ;;  %v508_v28 = vpop.f32.mrf.mxu0 }
  0xc0   :  { %v545_v21 = vpop.f32.mrf.mxu3  ;;  %641 = vst [vmem:[#allocation14] sm:$0xff] %v629_v24  ;;  %v521_v31 = vpop.f32.mrf.mxu1 }
  0xc1   :  { %v546_v25 = vadd.f32 %v545_v21, %v532_v18  ;;  %v657_v32 = vmax.f32 %v653_v26, 0.0 }
  0xc3   :  { %v606_v29 = vadd.f32 %v602_v20, %v546_v25  ;;  %v661_v33 = vmin.f32 %v657_v32, 1.0 }
  0xc5   :  { %vm610_vm1 = vcmp.ge.f32.partialorder %v606_v29, %v167_v19  ;;  %665 = vst [vmem:[#allocation15] sm:$0xff] %v661_v33 }
  0xc6   :  { %v992_v34 = vsel %vm610_vm1, 1.0, %v1306_v53  ;;  %v622_v35 = vsel %vm610_vm1, 0.1, %v606_v29  ;;  %v630_v36 = vsel %vm610_vm1, 1.0, %v626_v27 }
  0xc7   :  { %638 = vst [vmem:[#allocation12 + $0x8] sm:$0xff] %v622_v35  ;;  %v654_v37 = vadd.f32 %v992_v34, %v650_v30  ;;  %v534_v38 = vpop.f32.mrf.mxu2  ;;  %v633_v39 = vpack.c.bf16 %v992_v34, %v991_v56 }
  0xc8   :  { %v547_v40 = vpop.f32.mrf.mxu3  ;;  %642 = vst [vmem:[#allocation14 + $0x8] sm:$0xff] %v630_v36 }
  0xc9   :  { %v658_v41 = vmax.f32 %v654_v37, 0.0  ;;  %635 = vst [vmem:[#allocation11] sm:$0xff] %v633_v39 }
  0xcb   :  { %v662_v42 = vmin.f32 %v658_v41, 1.0 }
  0xcd   :  { %666 = vst [vmem:[#allocation15 + $0x8] sm:$0xff] %v662_v42 }
  0xd7   :  { %v558_v44 = vpop.f32.mrf.mxu0 }
  0xd8   :  { %v571_v47 = vpop.f32.mrf.mxu1 }
  0xd9   :  { %v572_v49 = vadd.f32 %v571_v47, %v558_v44 }
  0xdb   :  { %v607_v52 = vadd.f32 %v603_v46, %v572_v49 }
  0xdd   :  { %vm611_vm2 = vcmp.ge.f32.partialorder %v607_v52, %v168_v45 }
  0xde   :  { %v993_v57 = vsel %vm611_vm2, 1.0, %v1306_v53  ;;  %v623_v58 = vsel %vm611_vm2, 0.1, %v607_v52  ;;  %v631_v59 = vsel %vm611_vm2, 1.0, %v627_v50 }
  0xdf   :  { %v584_v60 = vpop.f32.mrf.mxu2  ;;  %639 = vst [vmem:[#allocation12 + $0x10] sm:$0xff] %v623_v58  ;;  %v655_v62 = vadd.f32 %v993_v57, %v651_v54  ;;  %v560_v1 = vpop.f32.mrf.mxu0 }
  0xe0   :  { %v597_v63 = vpop.f32.mrf.mxu3  ;;  %643 = vst [vmem:[#allocation14 + $0x10] sm:$0xff] %v631_v59  ;;  %v573_v3 = vpop.f32.mrf.mxu1 }
  0xe1   :  { %v598_v2 = vadd.f32 %v597_v63, %v584_v60  ;;  %v659_v4 = vmax.f32 %v655_v62, 0.0 }
  0xe3   :  { %v608_v6 = vadd.f32 %v604_v55, %v598_v2  ;;  %v663_v8 = vmin.f32 %v659_v4, 1.0 }
  0xe5   :  { %vm612_vm3 = vcmp.ge.f32.partialorder %v608_v6, %v169_v61  ;;  %667 = vst [vmem:[#allocation15 + $0x10] sm:$0xff] %v663_v8 }
  0xe6   :  { %v994_v9 = vsel %vm612_vm3, 1.0, %v1306_v53  ;;  %v624_v10 = vsel %vm612_vm3, 0.1, %v608_v6  ;;  %v632_v11 = vsel %vm612_vm3, 1.0, %v628_v5 }
  0xe7   :  { %640 = vst [vmem:[#allocation12 + $0x18] sm:$0xff] %v624_v10  ;;  %v656_v12 = vadd.f32 %v994_v9, %v652_v7  ;;  %v586_v13 = vpop.f32.mrf.mxu2  ;;  %v634_v14 = vpack.c.bf16 %v994_v9, %v993_v57 }
  0xe8   :  { %644 = vst [vmem:[#allocation14 + $0x18] sm:$0xff] %v632_v11  ;;  %v599_v15 = vpop.f32.mrf.mxu3  ;;  %690 = dma.vmem_to_hbm [thread:$0]  %s686_s4, 512, %s688_s9, [#allocation13]  }
  0xe9   :  { %v660_v16 = vmax.f32 %v656_v12, 0.0  ;;  %636 = vst [vmem:[#allocation11 + $0x8] sm:$0xff] %v634_v14  ;;  %701 = dma.vmem_to_hbm [thread:$0]  %s697_s16, 512, %s699_s19, [#allocation13]  }
  0xea   :  { %679 = dma.vmem_to_hbm [thread:$0]  %s675_s11, 256, %s677_s14, [#allocation4]  }
  0xeb   :  { %v664_v17 = vmin.f32 %v660_v16, 1.0 }
  0xed   :  { %668 = vst [vmem:[#allocation15 + $0x18] sm:$0xff] %v664_v17 }
  0xee   :  { %712 = dma.vmem_to_hbm [thread:$0]  %s708_s6, 512, %s710_s20, [#allocation16]  }
  0xef   :  { %1293 = dma.done.wait [#allocation4], 256  }
  0xf0   :  { %1294 = vsyncadd [#allocation4], 4294967040 }
  0xf1   :  { %1295 = dma.done.wait [#allocation13], 1024  }
  0xf2   :  { %1296 = vsyncadd [#allocation13], 4294966272 }
  0xf3   :  { %1297 = dma.done.wait [#allocation16], 512  }
  0xf4   :  { %1298 = vsyncadd [#allocation16], 4294966784 }
  0xf5   :  { %729 = vsyncpa [#allocation3], 1 }
  0xf6   :  { %730 = vsyncpa [#allocation6], 1 }
  0xf7   :  { %731 = vsyncpa [#allocation9], 1 }
  0xf8   :  { %732 = vsyncpa [#allocation4], 1 }
  0xf9   :  { %733 = vsyncpa [#allocation13], 1 }
  0xfa   :  { %734 = vsyncpa [#allocation16], 1 }

</bundles_post_ra>
